<compile_context>
chip_gen: v7x
topology: tpu7x:2x2x1
jax: 0.10.0
libtpu: 0.0.40
codegen_flags: <defaults>
</compile_context>

<pallas_src>
import jax
import jax.numpy as jnp
from jax.experimental import pallas as pl
from jax.experimental.pallas import tpu as pltpu


# ------------------------------ fused kernel --------------------------------

def _make_cond_conv_kernel(H, W, C, C_pad, O, K, E, pad, T_HW, n_t):
    HW = H * W
    inv_hw = 1.0 / float(HW)
    # x (flattened NCHW with H zero-padding) lives at lane offset `start` inside the
    # flat scratch; `start` lanes of zero slack at each end keep every tap window
    # [kh*W + kw, kh*W + kw + HW) in range.
    start = pad * W + pad
    flat_len = (H + 2 * pad) * W + 2 * pad

    def kernel(x_ref, fcwt_ref, fcb_ref, ew_ref, mask_ref, o_ref,
               xflat_s, patch_s, r_s):
        t = pl.program_id(1)

        # ---- per-sample init (tile 0): routing + padded flat activation ----
        @pl.when(t == 0)
        def _():
            x = x_ref[0]                                              # (C, HW) bf16
            # routing in f32 on VPU/XLU/EUP: r = sigmoid(fc_w @ GAP(x) + fc_b)
            gap = jnp.sum(x.astype(jnp.float32), axis=1, keepdims=True) * inv_hw  # (C,1)
            logits = jnp.sum(fcwt_ref[...] * gap, axis=0, keepdims=True) + fcb_ref[...]
            r_s[...] = jax.nn.sigmoid(logits)                         # (1, E) f32

            # zero ONLY the pad slack + pad channels (the [start, start+HW) band of
            # real channels is fully overwritten below), not the whole scratch.
            if start > 0:
                xflat_s[:, 0:start] = jnp.zeros((C_pad, start), xflat_s.dtype)
                xflat_s[:, start + HW:flat_len] = jnp.zeros((C_pad, start), xflat_s.dtype)
            if C_pad > C:
                xflat_s[C:C_pad, start:start + HW] = jnp.zeros((C_pad - C, HW),
                                                               xflat_s.dtype)
            xflat_s[0:C, start:start + HW] = x

        # ---- im2col for this spatial tile (bf16, sublane-aligned tap rows) ----
        if n_t > 1:
            toff = pl.multiple_of(t * T_HW, 128)
        for kh in range(K):
            for kw in range(K):
                tap = kh * K + kw
                off = kh * W + kw
                if n_t == 1:
                    win = xflat_s[:, off:off + T_HW]                  # (C_pad, T_HW)
                else:
                    win = xflat_s[:, pl.ds(toff + off, T_HW)]
                if kw != pad:
                    # TODO(synk): switch to masked stores if VALU ever binds.
                    win = win * mask_ref[kw:kw + 1, :]                # zero W-wrap cols
                patch_s[tap * C_pad:(tap + 1) * C_pad, :] = win

        # ---- one bf16 MXU matmul per tile, all experts stacked on M ----
        y2 = jnp.dot(ew_ref[...], patch_s[...],
                     preferred_element_type=jnp.float32)              # (E*O, T_HW) f32

        # ---- combine per-expert outputs with routing weights on the VPU ----
        r = r_s[...]                                                  # (1, E) f32
        acc = jnp.zeros((O, T_HW), jnp.float32)
        for e in range(E):                                            # small static unroll
            acc = acc + r[0:1, e:e + 1] * y2[e * O:(e + 1) * O, :]
        o_ref[...] = acc[None].astype(o_ref.dtype)                    # lane-dense store

    return kernel


# ----------------------------- param preparation -----------------------------

def prepare_cond_conv_params(fc_w, fc_b, kernel_weights):
    """One-time parameter prep (outside the hot path).

    kernel_weights (E, O, C, K, K) -> bf16 (E*O, K*K*C_pad) with (kh, kw, c) minor
    order and C zero-padded to a multiple of 8 so per-tap im2col stores and the
    contraction layout are sublane-aligned. fc_w is pre-transposed to (C, E) so the
    routing logits are a VPU multiply + reduce (no MXU pass).
    """
    E, O, C, K, _ = kernel_weights.shape
    C_pad = -(-C // 8) * 8
    ew = jnp.transpose(kernel_weights, (0, 1, 3, 4, 2))               # (E, O, K, K, C)
    if C_pad > C:
        ew = jnp.pad(ew, ((0, 0), (0, 0), (0, 0), (0, 0), (0, C_pad - C)))
    ew_flat = ew.reshape(E * O, K * K * C_pad).astype(jnp.bfloat16)
    fcw_t = jnp.asarray(fc_w, jnp.float32).T                          # (C, E)
    fcb_row = jnp.asarray(fc_b, jnp.float32).reshape(1, E)
    return fcw_t, fcb_row, ew_flat, int(C_pad)


def _pick_hw_tile(HW, cap=2048):
    """Largest tile <= cap dividing HW, preferring multiples of 256 (MXU N width)."""
    if HW <= cap:
        return HW
    for step in (256, 128):
        t = (cap // step) * step
        while t >= step:
            if HW % t == 0:
                return t
            t -= step
    return HW


# --------------------------------- wrapper -----------------------------------

def cond_conv_forward(x_nchw, params, *, kernel_size, stride=1, dilation=1,
                      groups=1, hw_tile=None):
    """CondConv forward (module defaults: bias=False, drop_ratio=0.0).

    x_nchw : (B, C, H, W) float32 (PyTorch NCHW layout)
    params : output of prepare_cond_conv_params
    returns: (B, O, H, W) float32
    """
    assert stride == 1 and dilation == 1 and groups == 1
    assert kernel_size % 2 == 1, "'same' auto_pad path implemented for odd kernels"

    fcw_t, fcb_row, ew_flat, C_pad = params
    B, C, H, W = x_nchw.shape
    Cw, E = fcw_t.shape
    assert Cw == C
    K = kernel_size
    KKCp = K * K * C_pad
    assert ew_flat.shape[1] == KKCp
    O = ew_flat.shape[0] // E
    pad = (dilation * (K - 1)) // 2
    HW = H * W
    flat_len = (H + 2 * pad) * W + 2 * pad

    T_HW = hw_tile if hw_tile is not None else _pick_hw_tile(HW)
    assert HW % T_HW == 0 and (T_HW == HW or T_HW % 128 == 0)
    n_t = HW // T_HW

    # NCHW kept: (B, C, H, W) -> (B, C, H*W) is a free metadata reshape; bf16 operands.
    x2d = x_nchw.reshape(B, C, HW).astype(jnp.bfloat16)

    # Per-kw validity masks for the W boundary of the flat shifted windows (K, HW).
    wpos = jnp.arange(HW, dtype=jnp.int32) % W
    masks = jnp.stack(
        [((wpos + kw >= pad) & (wpos + kw < W + pad)).astype(jnp.bfloat16)
         for kw in range(K)], axis=0)

    # Per-generation VMEM budget: ~100 MiB on v5e/v6e (128 MiB), ~48 MiB on v7x (64 MiB).
    try:
        vmem_cap = pltpu.get_tpu_info().vmem_capacity_bytes
    except Exception:
        vmem_cap = 64 * 1024 * 1024
    vmem_limit = int(min(100 * 1024 * 1024,
                         max(32 * 1024 * 1024, vmem_cap - 16 * 1024 * 1024)))

    kernel = _make_cond_conv_kernel(H, W, C, C_pad, O, K, E, pad, T_HW, n_t)
    y = pl.pallas_call(
        kernel,
        out_shape=jax.ShapeDtypeStruct((B, O, HW), jnp.float32),
        grid_spec=pltpu.PrefetchScalarGridSpec(
            num_scalar_prefetch=0,
            grid=(B, n_t),
            in_specs=[
                pl.BlockSpec((1, C, HW), lambda b, t: (b, 0, 0)),       # x (bf16)
                pl.BlockSpec((C, E), lambda b, t: (0, 0),               # fc_w^T (f32)
                             pipeline_mode=pl.Buffered(1)),
                pl.BlockSpec((1, E), lambda b, t: (0, 0),               # fc_b (f32)
                             pipeline_mode=pl.Buffered(1)),
                pl.BlockSpec((E * O, KKCp), lambda b, t: (0, 0),        # expert stack (bf16)
                             pipeline_mode=pl.Buffered(1)),
                pl.BlockSpec((K, T_HW), lambda b, t: (0, t)),           # kw boundary masks
            ],
            out_specs=pl.BlockSpec((1, O, T_HW), lambda b, t: (b, 0, t)),
            scratch_shapes=[
                pltpu.VMEM((C_pad, flat_len), jnp.bfloat16),            # padded flat x
                pltpu.VMEM((K * K * C_pad, T_HW), jnp.bfloat16),        # im2col patch tile
                pltpu.VMEM((1, E), jnp.float32),                        # routing weights
            ],
        ),
        compiler_params=pltpu.CompilerParams(
            dimension_semantics=("parallel", "arbitrary"),  # samples across TCs (v7x)
            vmem_limit_bytes=vmem_limit,
        ),
    )(x2d, fcw_t, fcb_row, ew_flat, masks)

    return y.reshape(B, O, H, W)


# ---------------------------- pure-JAX reference -----------------------------

def ref_cond_conv(x, fc_w, fc_b, kernel_weights, kernel_size):
    B, C, H, W = x.shape
    E, O = kernel_weights.shape[0], kernel_weights.shape[1]
    K = kernel_size
    gap = x.mean(axis=(2, 3))                                      # (B, C)
    r = jax.nn.sigmoid(gap @ fc_w.T + fc_b)                        # (B, E)
    w = (r @ kernel_weights.reshape(E, -1)).reshape(B, O, C, K, K)
    pad = (K - 1) // 2
    ys = []
    for b in range(B):
        y = jax.lax.conv_general_dilated(
            x[b:b + 1], w[b], window_strides=(1, 1),
            padding=[(pad, pad), (pad, pad)],
            dimension_numbers=("NCHW", "OIHW", "NCHW"))
        ys.append(y)
    return jnp.concatenate(ys, axis=0)


# ----------------------------------- main ------------------------------------

if __name__ == "__main__":
    B, C, H, W = 2, 4, 16, 16        # input (NCHW, like the PyTorch module)
    O, K, E = 8, 3, 8                # out_chans, kernel_size, num_experts

    key = jax.random.PRNGKey(0)
    k1, k2, k3, k4 = jax.random.split(key, 4)
    x = jax.random.normal(k1, (B, C, H, W), jnp.float32)
    fc_w = 0.1 * jax.random.normal(k2, (E, C), jnp.float32)            # routing fc weight
    fc_b = 0.1 * jax.random.normal(k3, (E,), jnp.float32)              # routing fc bias
    kernel_weights = 0.1 * jax.random.normal(k4, (E, O, C, K, K), jnp.float32)

    params = prepare_cond_conv_params(fc_w, fc_b, kernel_weights)      # one-time prep
    y = cond_conv_forward(x, params, kernel_size=K)
    y = jax.block_until_ready(y)

    y_ref = ref_cond_conv(x, fc_w, fc_b, kernel_weights, K)
    assert y.shape == (B, O, H, W)
    max_err = jnp.max(jnp.abs(y - y_ref))
    # bf16 conv operands (f32 accumulation) -> loosened parity vs the f32 reference.
    assert jnp.allclose(y, y_ref, rtol=5e-2, atol=6e-2), f"max abs err = {max_err}"

    print("KERNEL_OK")
</pallas_src>

<mosaic_0001>
module attributes {stable_mosaic.version = 11 : i64} {
  func.func @kernel(%arg0: i32, %arg1: i32, %arg2: memref<1x4x256xbf16, #tpu.memory_space<vmem>>, %arg3: memref<4x8xf32, #tpu.memory_space<vmem>>, %arg4: memref<1x8xf32, #tpu.memory_space<vmem>>, %arg5: memref<64x72xbf16, #tpu.memory_space<vmem>>, %arg6: memref<3x256xbf16, #tpu.memory_space<vmem>>, %arg7: memref<1x8x256xf32, #tpu.memory_space<vmem>>, %arg8: memref<8x290xbf16, #tpu.memory_space<vmem>>, %arg9: memref<72x256xbf16, #tpu.memory_space<vmem>>, %arg10: memref<1x8xf32, #tpu.memory_space<vmem>>) attributes {dimension_semantics = [#tpu.dimension_semantics<parallel>, #tpu.dimension_semantics<arbitrary>], iteration_bounds = array<i64: 2, 1>, scalar_prefetch = 0 : i64, scratch_operands = 3 : i64, tpu.core_type = #tpu.core_type<tc>, window_params = [{transform_indices = @transform_0, window_bounds = array<i64: 1, 4, 256>}, {pipeline_mode = #tpu.pipeline_mode<synchronous>, transform_indices = @transform_1, window_bounds = array<i64: 4, 8>}, {pipeline_mode = #tpu.pipeline_mode<synchronous>, transform_indices = @transform_2, window_bounds = array<i64: 1, 8>}, {pipeline_mode = #tpu.pipeline_mode<synchronous>, transform_indices = @transform_3, window_bounds = array<i64: 64, 72>}, {transform_indices = @transform_4, window_bounds = array<i64: 3, 256>}, {transform_indices = @transform_5, window_bounds = array<i64: 1, 8, 256>}]} {
    %c0_i32 = arith.constant 0 : i32
    %0 = arith.cmpi eq, %arg1, %c0_i32 : i32
    %1 = arith.extui %0 : i1 to i32
    %c0_i32_0 = arith.constant 0 : i32
    %2 = arith.cmpi ne, %1, %c0_i32_0 : i32
    scf.if %2 {
      %c0_44 = arith.constant 0 : index
      %c0_45 = arith.constant 0 : index
      %c0_46 = arith.constant 0 : index
      %86 = vector.load %arg2[%c0_44, %c0_45, %c0_46] : memref<1x4x256xbf16, #tpu.memory_space<vmem>>, vector<1x4x256xbf16>
      %87 = vector.shape_cast %86 : vector<1x4x256xbf16> to vector<4x256xbf16>
      %88 = arith.extf %87 : vector<4x256xbf16> to vector<4x256xf32>
      %cst_47 = arith.constant dense<0.000000e+00> : vector<4xf32>
      %89 = vector.multi_reduction <add>, %88, %cst_47 [1] : vector<4x256xf32> to vector<4xf32>
      %90 = vector.shape_cast %89 : vector<4xf32> to vector<4x1xf32>
      %cst_48 = arith.constant 3.906250e-03 : f32
      %91 = vector.broadcast %cst_48 : f32 to vector<4x1xf32>
      %92 = arith.mulf %90, %91 : vector<4x1xf32>
      %c0_49 = arith.constant 0 : index
      %c0_50 = arith.constant 0 : index
      %93 = vector.load %arg3[%c0_49, %c0_50] : memref<4x8xf32, #tpu.memory_space<vmem>>, vector<4x8xf32>
      %94 = vector.broadcast %92 : vector<4x1xf32> to vector<4x8xf32>
      %95 = arith.mulf %93, %94 : vector<4x8xf32>
      %cst_51 = arith.constant dense<0.000000e+00> : vector<8xf32>
      %96 = vector.multi_reduction <add>, %95, %cst_51 [0] : vector<4x8xf32> to vector<8xf32>
      %97 = vector.shape_cast %96 : vector<8xf32> to vector<1x8xf32>
      %c0_52 = arith.constant 0 : index
      %c0_53 = arith.constant 0 : index
      %98 = vector.load %arg4[%c0_52, %c0_53] : memref<1x8xf32, #tpu.memory_space<vmem>>, vector<1x8xf32>
      %99 = arith.addf %97, %98 : vector<1x8xf32>
      %100 = arith.negf %99 : vector<1x8xf32>
      %101 = math.exp %100 : vector<1x8xf32>
      %cst_54 = arith.constant 1.000000e+00 : f32
      %102 = vector.broadcast %cst_54 : f32 to vector<1x8xf32>
      %103 = arith.addf %102, %101 : vector<1x8xf32>
      %104 = arith.divf %102, %103 : vector<1x8xf32>
      %c0_55 = arith.constant 0 : index
      %c0_56 = arith.constant 0 : index
      %105 = vector.load %arg10[%c0_55, %c0_56] : memref<1x8xf32, #tpu.memory_space<vmem>>, vector<1x8xf32>
      tpu.vector_store %arg10[%c0_55, %c0_56], %104 {strides = array<i32>} : memref<1x8xf32, #tpu.memory_space<vmem>>, vector<1x8xf32>,
      %cst_57 = arith.constant 0.000000e+00 : bf16
      %106 = vector.broadcast %cst_57 : bf16 to vector<8x17xbf16>
      %c0_58 = arith.constant 0 : index
      %c0_59 = arith.constant 0 : index
      %107 = vector.load %arg8[%c0_58, %c0_59] : memref<8x290xbf16, #tpu.memory_space<vmem>>, vector<8x17xbf16>
      tpu.vector_store %arg8[%c0_58, %c0_59], %106 {strides = array<i32>} : memref<8x290xbf16, #tpu.memory_space<vmem>>, vector<8x17xbf16>,
      %cst_60 = arith.constant 0.000000e+00 : bf16
      %108 = vector.broadcast %cst_60 : bf16 to vector<8x17xbf16>
      %c0_61 = arith.constant 0 : index
      %c273 = arith.constant 273 : index
      %109 = vector.load %arg8[%c0_61, %c273] : memref<8x290xbf16, #tpu.memory_space<vmem>>, vector<8x17xbf16>
      tpu.vector_store %arg8[%c0_61, %c273], %108 {strides = array<i32>} : memref<8x290xbf16, #tpu.memory_space<vmem>>, vector<8x17xbf16>,
      %cst_62 = arith.constant 0.000000e+00 : bf16
      %110 = vector.broadcast %cst_62 : bf16 to vector<4x256xbf16>
      %c4 = arith.constant 4 : index
      %c17_63 = arith.constant 17 : index
      %111 = vector.load %arg8[%c4, %c17_63] : memref<8x290xbf16, #tpu.memory_space<vmem>>, vector<4x256xbf16>
      tpu.vector_store %arg8[%c4, %c17_63], %110 {strides = array<i32>} : memref<8x290xbf16, #tpu.memory_space<vmem>>, vector<4x256xbf16>,
      %c0_64 = arith.constant 0 : index
      %c17_65 = arith.constant 17 : index
      %112 = vector.load %arg8[%c0_64, %c17_65] : memref<8x290xbf16, #tpu.memory_space<vmem>>, vector<4x256xbf16>
      tpu.vector_store %arg8[%c0_64, %c17_65], %87 {strides = array<i32>} : memref<8x290xbf16, #tpu.memory_space<vmem>>, vector<4x256xbf16>,
    } else {
    }
    %c0 = arith.constant 0 : index
    %c0_1 = arith.constant 0 : index
    %3 = vector.load %arg8[%c0, %c0_1] : memref<8x290xbf16, #tpu.memory_space<vmem>>, vector<8x256xbf16>
    %c0_2 = arith.constant 0 : index
    %c0_3 = arith.constant 0 : index
    %4 = vector.load %arg6[%c0_2, %c0_3] : memref<3x256xbf16, #tpu.memory_space<vmem>>, vector<1x256xbf16>
    %5 = vector.broadcast %4 : vector<1x256xbf16> to vector<8x256xbf16>
    %6 = arith.mulf %3, %5 : vector<8x256xbf16>
    %c0_4 = arith.constant 0 : index
    %c0_5 = arith.constant 0 : index
    %7 = vector.load %arg9[%c0_4, %c0_5] : memref<72x256xbf16, #tpu.memory_space<vmem>>, vector<8x256xbf16>
    tpu.vector_store %arg9[%c0_4, %c0_5], %6 {strides = array<i32>} : memref<72x256xbf16, #tpu.memory_space<vmem>>, vector<8x256xbf16>,
    %c0_6 = arith.constant 0 : index
    %c1 = arith.constant 1 : index
    %8 = vector.load %arg8[%c0_6, %c1] : memref<8x290xbf16, #tpu.memory_space<vmem>>, vector<8x256xbf16>
    %c8 = arith.constant 8 : index
    %c0_7 = arith.constant 0 : index
    %9 = vector.load %arg9[%c8, %c0_7] : memref<72x256xbf16, #tpu.memory_space<vmem>>, vector<8x256xbf16>
    tpu.vector_store %arg9[%c8, %c0_7], %8 {strides = array<i32>} : memref<72x256xbf16, #tpu.memory_space<vmem>>, vector<8x256xbf16>,
    %c0_8 = arith.constant 0 : index
    %c2 = arith.constant 2 : index
    %10 = vector.load %arg8[%c0_8, %c2] : memref<8x290xbf16, #tpu.memory_space<vmem>>, vector<8x256xbf16>
    %c2_9 = arith.constant 2 : index
    %c0_10 = arith.constant 0 : index
    %11 = vector.load %arg6[%c2_9, %c0_10] : memref<3x256xbf16, #tpu.memory_space<vmem>>, vector<1x256xbf16>
    %12 = vector.broadcast %11 : vector<1x256xbf16> to vector<8x256xbf16>
    %13 = arith.mulf %10, %12 : vector<8x256xbf16>
    %c16 = arith.constant 16 : index
    %c0_11 = arith.constant 0 : index
    %14 = vector.load %arg9[%c16, %c0_11] : memref<72x256xbf16, #tpu.memory_space<vmem>>, vector<8x256xbf16>
    tpu.vector_store %arg9[%c16, %c0_11], %13 {strides = array<i32>} : memref<72x256xbf16, #tpu.memory_space<vmem>>, vector<8x256xbf16>,
    %c0_12 = arith.constant 0 : index
    %c16_13 = arith.constant 16 : index
    %15 = vector.load %arg8[%c0_12, %c16_13] : memref<8x290xbf16, #tpu.memory_space<vmem>>, vector<8x256xbf16>
    %c0_14 = arith.constant 0 : index
    %c0_15 = arith.constant 0 : index
    %16 = vector.load %arg6[%c0_14, %c0_15] : memref<3x256xbf16, #tpu.memory_space<vmem>>, vector<1x256xbf16>
    %17 = vector.broadcast %16 : vector<1x256xbf16> to vector<8x256xbf16>
    %18 = arith.mulf %15, %17 : vector<8x256xbf16>
    %c24 = arith.constant 24 : index
    %c0_16 = arith.constant 0 : index
    %19 = vector.load %arg9[%c24, %c0_16] : memref<72x256xbf16, #tpu.memory_space<vmem>>, vector<8x256xbf16>
    tpu.vector_store %arg9[%c24, %c0_16], %18 {strides = array<i32>} : memref<72x256xbf16, #tpu.memory_space<vmem>>, vector<8x256xbf16>,
    %c0_17 = arith.constant 0 : index
    %c17 = arith.constant 17 : index
    %20 = vector.load %arg8[%c0_17, %c17] : memref<8x290xbf16, #tpu.memory_space<vmem>>, vector<8x256xbf16>
    %c32 = arith.constant 32 : index
    %c0_18 = arith.constant 0 : index
    %21 = vector.load %arg9[%c32, %c0_18] : memref<72x256xbf16, #tpu.memory_space<vmem>>, vector<8x256xbf16>
    tpu.vector_store %arg9[%c32, %c0_18], %20 {strides = array<i32>} : memref<72x256xbf16, #tpu.memory_space<vmem>>, vector<8x256xbf16>,
    %c0_19 = arith.constant 0 : index
    %c18 = arith.constant 18 : index
    %22 = vector.load %arg8[%c0_19, %c18] : memref<8x290xbf16, #tpu.memory_space<vmem>>, vector<8x256xbf16>
    %c2_20 = arith.constant 2 : index
    %c0_21 = arith.constant 0 : index
    %23 = vector.load %arg6[%c2_20, %c0_21] : memref<3x256xbf16, #tpu.memory_space<vmem>>, vector<1x256xbf16>
    %24 = vector.broadcast %23 : vector<1x256xbf16> to vector<8x256xbf16>
    %25 = arith.mulf %22, %24 : vector<8x256xbf16>
    %c40 = arith.constant 40 : index
    %c0_22 = arith.constant 0 : index
    %26 = vector.load %arg9[%c40, %c0_22] : memref<72x256xbf16, #tpu.memory_space<vmem>>, vector<8x256xbf16>
    tpu.vector_store %arg9[%c40, %c0_22], %25 {strides = array<i32>} : memref<72x256xbf16, #tpu.memory_space<vmem>>, vector<8x256xbf16>,
    %c0_23 = arith.constant 0 : index
    %c32_24 = arith.constant 32 : index
    %27 = vector.load %arg8[%c0_23, %c32_24] : memref<8x290xbf16, #tpu.memory_space<vmem>>, vector<8x256xbf16>
    %c0_25 = arith.constant 0 : index
    %c0_26 = arith.constant 0 : index
    %28 = vector.load %arg6[%c0_25, %c0_26] : memref<3x256xbf16, #tpu.memory_space<vmem>>, vector<1x256xbf16>
    %29 = vector.broadcast %28 : vector<1x256xbf16> to vector<8x256xbf16>
    %30 = arith.mulf %27, %29 : vector<8x256xbf16>
    %c48 = arith.constant 48 : index
    %c0_27 = arith.constant 0 : index
    %31 = vector.load %arg9[%c48, %c0_27] : memref<72x256xbf16, #tpu.memory_space<vmem>>, vector<8x256xbf16>
    tpu.vector_store %arg9[%c48, %c0_27], %30 {strides = array<i32>} : memref<72x256xbf16, #tpu.memory_space<vmem>>, vector<8x256xbf16>,
    %c0_28 = arith.constant 0 : index
    %c33 = arith.constant 33 : index
    %32 = vector.load %arg8[%c0_28, %c33] : memref<8x290xbf16, #tpu.memory_space<vmem>>, vector<8x256xbf16>
    %c56 = arith.constant 56 : index
    %c0_29 = arith.constant 0 : index
    %33 = vector.load %arg9[%c56, %c0_29] : memref<72x256xbf16, #tpu.memory_space<vmem>>, vector<8x256xbf16>
    tpu.vector_store %arg9[%c56, %c0_29], %32 {strides = array<i32>} : memref<72x256xbf16, #tpu.memory_space<vmem>>, vector<8x256xbf16>,
    %c0_30 = arith.constant 0 : index
    %c34 = arith.constant 34 : index
    %34 = vector.load %arg8[%c0_30, %c34] : memref<8x290xbf16, #tpu.memory_space<vmem>>, vector<8x256xbf16>
    %c2_31 = arith.constant 2 : index
    %c0_32 = arith.constant 0 : index
    %35 = vector.load %arg6[%c2_31, %c0_32] : memref<3x256xbf16, #tpu.memory_space<vmem>>, vector<1x256xbf16>
    %36 = vector.broadcast %35 : vector<1x256xbf16> to vector<8x256xbf16>
    %37 = arith.mulf %34, %36 : vector<8x256xbf16>
    %c64 = arith.constant 64 : index
    %c0_33 = arith.constant 0 : index
    %38 = vector.load %arg9[%c64, %c0_33] : memref<72x256xbf16, #tpu.memory_space<vmem>>, vector<8x256xbf16>
    tpu.vector_store %arg9[%c64, %c0_33], %37 {strides = array<i32>} : memref<72x256xbf16, #tpu.memory_space<vmem>>, vector<8x256xbf16>,
    %c0_34 = arith.constant 0 : index
    %c0_35 = arith.constant 0 : index
    %39 = vector.load %arg5[%c0_34, %c0_35] : memref<64x72xbf16, #tpu.memory_space<vmem>>, vector<64x72xbf16>
    %c0_36 = arith.constant 0 : index
    %c0_37 = arith.constant 0 : index
    %40 = vector.load %arg9[%c0_36, %c0_37] : memref<72x256xbf16, #tpu.memory_space<vmem>>, vector<72x256xbf16>
    %cst = arith.constant dense<0.000000e+00> : vector<64x256xf32>
    %41 = tpu.matmul %39, %40, %cst {dimension_numbers = #tpu.dot_dimension_numbers<[1], [0], [0], [1], [0, 0, 1, 1], [], []>} : vector<64x72xbf16>, vector<72x256xbf16>, vector<64x256xf32> -> vector<64x256xf32>
    %c0_38 = arith.constant 0 : index
    %c0_39 = arith.constant 0 : index
    %42 = vector.load %arg10[%c0_38, %c0_39] : memref<1x8xf32, #tpu.memory_space<vmem>>, vector<1x8xf32>
    %cst_40 = arith.constant 0.000000e+00 : f32
    %43 = vector.broadcast %cst_40 : f32 to vector<8x256xf32>
    %44 = vector.extract_strided_slice %42 {offsets = [0, 0], sizes = [1, 1], strides = [1, 1]} : vector<1x8xf32> to vector<1x1xf32>
    %45 = vector.extract_strided_slice %41 {offsets = [0, 0], sizes = [8, 256], strides = [1, 1]} : vector<64x256xf32> to vector<8x256xf32>
    %46 = vector.broadcast %44 : vector<1x1xf32> to vector<8x256xf32>
    %47 = arith.mulf %46, %45 : vector<8x256xf32>
    %48 = arith.addf %43, %47 : vector<8x256xf32>
    %49 = vector.extract_strided_slice %42 {offsets = [0, 1], sizes = [1, 1], strides = [1, 1]} : vector<1x8xf32> to vector<1x1xf32>
    %50 = vector.extract_strided_slice %41 {offsets = [8, 0], sizes = [8, 256], strides = [1, 1]} : vector<64x256xf32> to vector<8x256xf32>
    %51 = vector.broadcast %49 : vector<1x1xf32> to vector<8x256xf32>
    %52 = arith.mulf %51, %50 : vector<8x256xf32>
    %53 = arith.addf %48, %52 : vector<8x256xf32>
    %54 = vector.extract_strided_slice %42 {offsets = [0, 2], sizes = [1, 1], strides = [1, 1]} : vector<1x8xf32> to vector<1x1xf32>
    %55 = vector.extract_strided_slice %41 {offsets = [16, 0], sizes = [8, 256], strides = [1, 1]} : vector<64x256xf32> to vector<8x256xf32>
    %56 = vector.broadcast %54 : vector<1x1xf32> to vector<8x256xf32>
    %57 = arith.mulf %56, %55 : vector<8x256xf32>
    %58 = arith.addf %53, %57 : vector<8x256xf32>
    %59 = vector.extract_strided_slice %42 {offsets = [0, 3], sizes = [1, 1], strides = [1, 1]} : vector<1x8xf32> to vector<1x1xf32>
    %60 = vector.extract_strided_slice %41 {offsets = [24, 0], sizes = [8, 256], strides = [1, 1]} : vector<64x256xf32> to vector<8x256xf32>
    %61 = vector.broadcast %59 : vector<1x1xf32> to vector<8x256xf32>
    %62 = arith.mulf %61, %60 : vector<8x256xf32>
    %63 = arith.addf %58, %62 : vector<8x256xf32>
    %64 = vector.extract_strided_slice %42 {offsets = [0, 4], sizes = [1, 1], strides = [1, 1]} : vector<1x8xf32> to vector<1x1xf32>
    %65 = vector.extract_strided_slice %41 {offsets = [32, 0], sizes = [8, 256], strides = [1, 1]} : vector<64x256xf32> to vector<8x256xf32>
    %66 = vector.broadcast %64 : vector<1x1xf32> to vector<8x256xf32>
    %67 = arith.mulf %66, %65 : vector<8x256xf32>
    %68 = arith.addf %63, %67 : vector<8x256xf32>
    %69 = vector.extract_strided_slice %42 {offsets = [0, 5], sizes = [1, 1], strides = [1, 1]} : vector<1x8xf32> to vector<1x1xf32>
    %70 = vector.extract_strided_slice %41 {offsets = [40, 0], sizes = [8, 256], strides = [1, 1]} : vector<64x256xf32> to vector<8x256xf32>
    %71 = vector.broadcast %69 : vector<1x1xf32> to vector<8x256xf32>
    %72 = arith.mulf %71, %70 : vector<8x256xf32>
    %73 = arith.addf %68, %72 : vector<8x256xf32>
    %74 = vector.extract_strided_slice %42 {offsets = [0, 6], sizes = [1, 1], strides = [1, 1]} : vector<1x8xf32> to vector<1x1xf32>
    %75 = vector.extract_strided_slice %41 {offsets = [48, 0], sizes = [8, 256], strides = [1, 1]} : vector<64x256xf32> to vector<8x256xf32>
    %76 = vector.broadcast %74 : vector<1x1xf32> to vector<8x256xf32>
    %77 = arith.mulf %76, %75 : vector<8x256xf32>
    %78 = arith.addf %73, %77 : vector<8x256xf32>
    %79 = vector.extract_strided_slice %42 {offsets = [0, 7], sizes = [1, 1], strides = [1, 1]} : vector<1x8xf32> to vector<1x1xf32>
    %80 = vector.extract_strided_slice %41 {offsets = [56, 0], sizes = [8, 256], strides = [1, 1]} : vector<64x256xf32> to vector<8x256xf32>
    %81 = vector.broadcast %79 : vector<1x1xf32> to vector<8x256xf32>
    %82 = arith.mulf %81, %80 : vector<8x256xf32>
    %83 = arith.addf %78, %82 : vector<8x256xf32>
    %84 = vector.shape_cast %83 : vector<8x256xf32> to vector<1x8x256xf32>
    %c0_41 = arith.constant 0 : index
    %c0_42 = arith.constant 0 : index
    %c0_43 = arith.constant 0 : index
    %85 = vector.load %arg7[%c0_41, %c0_42, %c0_43] : memref<1x8x256xf32, #tpu.memory_space<vmem>>, vector<1x8x256xf32>
    tpu.vector_store %arg7[%c0_41, %c0_42, %c0_43], %84 {strides = array<i32>} : memref<1x8x256xf32, #tpu.memory_space<vmem>>, vector<1x8x256xf32>,
    return
  }
  func.func @transform_0(%arg0: i32, %arg1: i32) -> (i32, i32, i32) {
    %c0_i32 = arith.constant 0 : i32
    %c0_i32_0 = arith.constant 0 : i32
    %c0_i32_1 = arith.constant 0 : i32
    return %arg0, %c0_i32, %c0_i32_0 : i32, i32, i32
  }
  func.func @transform_1(%arg0: i32, %arg1: i32) -> (i32, i32) {
    %c0_i32 = arith.constant 0 : i32
    %c0_i32_0 = arith.constant 0 : i32
    %c0_i32_1 = arith.constant 0 : i32
    return %c0_i32, %c0_i32_0 : i32, i32
  }
  func.func @transform_2(%arg0: i32, %arg1: i32) -> (i32, i32) {
    %c0_i32 = arith.constant 0 : i32
    %c0_i32_0 = arith.constant 0 : i32
    %c0_i32_1 = arith.constant 0 : i32
    return %c0_i32, %c0_i32_0 : i32, i32
  }
  func.func @transform_3(%arg0: i32, %arg1: i32) -> (i32, i32) {
    %c0_i32 = arith.constant 0 : i32
    %c0_i32_0 = arith.constant 0 : i32
    %c0_i32_1 = arith.constant 0 : i32
    return %c0_i32, %c0_i32_0 : i32, i32
  }
  func.func @transform_4(%arg0: i32, %arg1: i32) -> (i32, i32) {
    %c0_i32 = arith.constant 0 : i32
    %c0_i32_0 = arith.constant 0 : i32
    return %c0_i32, %arg1 : i32, i32
  }
  func.func @transform_5(%arg0: i32, %arg1: i32) -> (i32, i32, i32) {
    %c0_i32 = arith.constant 0 : i32
    %c0_i32_0 = arith.constant 0 : i32
    return %arg0, %c0_i32, %arg1 : i32, i32, i32
  }
}

</mosaic_0001>

<bundles_post_ra>
// kernel: tpu_custom_call.1
= control target key start
LH: loop header
LB: loop body
LE: loop exit
PB: predicated region body
PF: predicated region fallthrough
CT: control target
= control target key end

     0   :  { %10 = vsyncpa [#allocation6], 0  ;;  %s1817_s0 = inlined_call_operand.hbm [shape: bf16[2,4,256], index: 0, kind: input, shape index: {}]   ;;  %s1818_s1 = inlined_call_operand.hbm [shape: f32[4,8], index: 1, kind: input, shape index: {}]   ;;  %s1819_s2 = inlined_call_operand.vmem [shape: f32[1,8], index: 2, kind: input, shape index: {}]   ;;  %s1820_s3 = inlined_call_operand.hbm [shape: bf16[64,72], index: 3, kind: input, shape index: {}]   ;;  %s1821_s4 = inlined_call_operand.vmem [shape: bf16[3,256], index: 4, kind: input, shape index: {}]   ;;  %s1822_s5 = inlined_call_operand.hbm [shape: f32[2,8,256], index: 5, kind: output, shape index: {}]  }
   0x1   :  { %12 = vsyncpa [#allocation6 + $0x1], 0 }
   0x2   :  { %13 = vsyncpa [#allocation9], 0 }
   0x3   :  { %14 = vsyncpa [#allocation7], 0 }
   0x4   :  { %16 = vsyncpa [#allocation7 + $0x1], 0  ;;  %s1519_s18 = smov 0   ;;  %s1521_s19 = smov 0  }
   0x5   :  { %s1523_s20 = smov 0   ;;  %s1525_s21 = smov 0  }
   0x6   :  { %s1527_s22 = smov 0   ;;  %s1529_s23 = smov 0  }
   0x7 LB: > { %s1096_s24 = sadd.s32 4294967295, %s1458_s23   ;;  %s1097_s25 = sadd.s32 4294967294, %s1458_s23   ;;  %s1458_s23 = sphi %s1529_s23, %s22_s23   ;;  %s1454_s22 = sphi %s1527_s22, %s1845_s22   ;;  %s1450_s21 = sphi %s1525_s21, %s1844_s21   ;;  %s1446_s20 = sphi %s1523_s20, %s1843_s20   ;;  %s1442_s19 = sphi %s1521_s19, %s1842_s19   ;;  %s1438_s18 = sphi %s1519_s18, %s1841_s18  }
   0x8   : > { %p54_p0 = scmp.ne.s32.totalorder %s1442_s19, %s1438_s18  ;;  %p1553_p1 = scmp.eq.s32.totalorder %s1096_s24, 0 }
   0x9   : > { %p1557_p2 = scmp.eq.s32.totalorder %s1096_s24, 1  ;;  %p175_p3 = scmp.eq.s32.totalorder %s1097_s25, 1 }
   0xa   : > { %s1827_s26 = scalar_select %p1553_p1, 1, 0 }
   0xb   : > { %s1828_s27 = scalar_select %p1557_p2, 1, 0 }
   0xc   : > { %p1563_p4 = por %p1553_p1, %p54_p0  ;;  %p1098_p5 = scmp.ge.s32.totalorder %s1458_s23, 1 }
   0xd   : > { %p1568_p6 = por %p175_p3, %p54_p0  ;;  %p182_p7 = scmp.lt.s32.totalorder %s1458_s23, 3 }
   0xe   : > { %s1829_s28 = scalar_select %p1563_p4, 1, 0 }
   0xf   : > { %s1830_s29 = scalar_select %p1568_p6, 1, 0 }
  0x10   : > { %p1573_p8 = pnand %p1098_p5, %p182_p7  ;;  %s1460_s6 = smov [#allocation8]  }
  0x11   : > { %s195_s7 = sshll.u32 %s1460_s6, 4  ;;  %s1461_s8 = smov [#allocation10]   ;;  %s196_s7 = int_to_ptr.vmem [resolvable:$true] %s195_s7 }
  0x12   : > { %s1831_s30 = scalar_select %p1573_p8, 1, 0 }
  0x13   : > { %p1173_p10 = pneg %p1573_p8  ;;  %s208_s9 = sshll.u32 %s1461_s8, 4  ;;  %s1586_s9 = int_to_ptr.vmem [resolvable:$true] %s208_s9 }
  0x14   : > { %s1286_s13 = scalar_lea.hbm %s1818_s1, 64 }
  0x15   : > { %p1582_p11 = pnand %p1173_p10, %p1553_p1  ;;  %p1287_p12 = scmp.ne.s32.totalorder %s1818_s1, %s1286_s13 }
  0x16   : > { %p1293_p5 = scmp.lt.u32.totalorder %s1286_s13, %s1818_s1 }
  0x17   : > { %p1288_p13 = pneg %p1582_p11 }
  0x19   : > { %p1289_p0 = pnand %p1288_p13, %p1287_p12 }
  0x1b   : > { %p1290_p3 = pneg %p1289_p0 }
  0x1d   : > { %p1295_p7 = pnand %p1293_p5, %p1290_p3 }
  0x1f   : > { %1298 = shalt.err (!%p1295_p7)
}
  0x20   : > { %s1299_s24 = scalar_lea.vmem %s196_s7, 64  ;;  %p1307_p1 = scmp.lt.s32.totalorder %s196_s7, %s196_s7 }
  0x21   : > { %p1300_p10 = scmp.ne.s32.totalorder %s196_s7, %s1299_s24  ;;  %p1308_p4 = scmp.lt.s32.totalorder %s1299_s24, %s1299_s24 }
  0x23   : > { %p1302_p9 = pnand %p1300_p10, %p1288_p13  ;;  %p1309_p8 = por %p1308_p4, %p1307_p1 }
  0x25   : > { %p1303_p6 = pneg %p1302_p9 }
  0x27   : > { %p1310_p2 = pnand %p1309_p8, %p1303_p6 }
  0x29   : > { %1313 = shalt.err (!%p1310_p2)
}
  0x2a   : > { %1176 = dma.hbm_to_vmem [thread:$0]  (!%p1582_p11), %s1818_s1, 64, %s196_s7, [#allocation9]  }
  0x2b   : > { %s1314_s12 = scalar_lea.hbm %s1820_s3, 512 }
  0x2c   : > { %p1315_p9 = scmp.ne.s32.totalorder %s1820_s3, %s1314_s12  ;;  %p1321_p2 = scmp.lt.u32.totalorder %s1314_s12, %s1820_s3 }
  0x2e   : > { %p1317_p1 = pnand %p1315_p9, %p1288_p13 }
  0x30   : > { %p1318_p4 = pneg %p1317_p1 }
  0x32   : > { %p1323_p6 = pnand %p1321_p2, %p1318_p4 }
  0x34   : > { %1326 = shalt.err (!%p1323_p6)
}
  0x35   : > { %s1327_s7 = scalar_lea.vmem %s1586_s9, 512  ;;  %p1335_p3 = scmp.lt.s32.totalorder %s1586_s9, %s1586_s9 }
  0x36   : > { %p1328_p8 = scmp.ne.s32.totalorder %s1586_s9, %s1327_s7  ;;  %p1336_p5 = scmp.lt.s32.totalorder %s1327_s7, %s1327_s7 }
  0x38   : > { %p1330_p12 = pnand %p1328_p8, %p1288_p13  ;;  %p1337_p7 = por %p1336_p5, %p1335_p3 }
  0x3a   : > { %p1331_p0 = pneg %p1330_p12 }
  0x3c   : > { %p1338_p10 = pnand %p1337_p7, %p1331_p0 }
  0x3e   : > { %1341 = shalt.err (!%p1338_p10)
}
  0x3f   : > { %s1462_s17 = smov 64   ;;  %s1463_s24 = smov 4  }
  0x40   : > { %1179 = dma.hbm_to_vmem [thread:$0]  (!%p1582_p11), %s1820_s3, 512, %s1586_s9, [#allocation9], %s1462_s17, %s1462_s17, %s1463_s24  }
  0x41   : > { %s34_s8 = sadd.s32 1, %s1454_s22  ;;  %s41_s11 = sadd.s32 1, %s1446_s20 }
  0x42   : > { %p36_p13 = scmp.ge.s32.totalorder %s34_s8, 2  ;;  %p48_p9 = scmp.ne.s32.totalorder %s1446_s20, %s1442_s19 }
  0x43   : > { %p49_p1 = scmp.eq.s32.totalorder %s1458_s23, 0  ;;  %p1190_p4 = scmp.lt.s32.totalorder %s1458_s23, 2 }
  0x44   : > { %s1847_s8 = smov (%p36_p13, %s34_s8), 0  ;;  %p1833_p6 = scmp.ne.s32.totalorder %s1828_s27, 0 }
  0x45   : > { %p50_p2 = por %p49_p1, %p48_p9  ;;  %s38_s10 = ssub.s32 %s1454_s22, %s1847_s8 }
  0x46   : > { %p1645_p8 = por %p1833_p6, %p48_p9  ;;  %s231_s13 = sand.u32 1, %s1446_s20  }
  0x47   : > { %p39_p12 = scmp.eq.s32.totalorder %s38_s10, 0  ;;  %s1103_s9 = sshll.u32 %s231_s13, 2 }
  0x48   : > { %s1149_s14 = sshll.u32 %s1454_s22, 6  ;;  %s235_s27 = scalar_lea.vmem [#allocation5], %s1103_s9 }
  0x49   : > { %s1654_s15 = scalar_select %p39_p12, %s1446_s20, %s41_s11  }
  0x4a   : > { %s1659_s17 = scalar_lea.hbm %s1817_s0, %s1149_s14  ;;  %s243_s24 = sshll.u32 %s235_s27, 4  ;;  %s1667_s24 = int_to_ptr.vmem [resolvable:$true] %s243_s24 }
  0x4b   : > { %p1663_p11 = pnand %p1190_p4, %p50_p2  ;;  %s232_s6 = scalar_lea.sflag [#allocation6], %s231_s13 }
  0x4c   : > { %s1342_s11 = scalar_lea.hbm %s1659_s17, 64  ;;  %s1347_s14 = scalar_lea.hbm %s1817_s0, 128 }
  0x4d   : > { %p1343_p0 = scmp.ne.s32.totalorder %s1659_s17, %s1342_s11  ;;  %p1344_p3 = pneg %p1663_p11 }
  0x4e   : > { %p1348_p10 = scmp.lt.u32.totalorder %s1659_s17, %s1817_s0  ;;  %p1349_p13 = scmp.lt.u32.totalorder %s1347_s14, %s1342_s11 }
  0x4f   : > { %p1345_p5 = pnand %p1344_p3, %p1343_p0  ;;  %p1351_p1 = scmp.lt.u32.totalorder %s1342_s11, %s1659_s17 }
  0x50   : > { %p1350_p9 = por %p1349_p13, %p1348_p10 }
  0x51   : > { %p1346_p7 = pneg %p1345_p5 }
  0x52   : > { %p1352_p4 = por %p1351_p1, %p1350_p9 }
  0x54   : > { %p1353_p2 = pnand %p1352_p4, %p1346_p7 }
  0x56   : > { %1356 = shalt.err (!%p1353_p2)
}
  0x57   : > { %s1357_s13 = scalar_lea.vmem %s1667_s24, 64  ;;  %s1464_s27 = smov [#allocation5]  }
  0x58   : > { %p1358_p6 = scmp.ne.s32.totalorder %s1667_s24, %s1357_s13  ;;  %s1362_s10 = sshll.u32 %s1464_s27, 4  ;;  %s1363_s10 = int_to_ptr.vmem [resolvable:$false] %s1362_s10 }
  0x59   : > { %s1364_s9 = scalar_lea.vmem %s1363_s10, 128  ;;  %p1365_p5 = scmp.lt.s32.totalorder %s1667_s24, %s1363_s10 }
  0x5a   : > { %p1360_p12 = pnand %p1358_p6, %p1344_p3  ;;  %p1366_p10 = scmp.lt.s32.totalorder %s1364_s9, %s1357_s13 }
  0x5c   : > { %p1361_p0 = pneg %p1360_p12  ;;  %p1367_p13 = por %p1366_p10, %p1365_p5 }
  0x5e   : > { %p1368_p9 = pnand %p1367_p13, %p1361_p0 }
  0x60   : > { %1371 = shalt.err (!%p1368_p9)
}
  0x61   : > { %1183 = dma.hbm_to_vmem [thread:$0]  (!%p1663_p11), %s1659_s17, 64, %s1667_s24, %s232_s6  }
  0x62   : > { %p1836_p7 = scmp.ne.s32.totalorder %s1831_s30, 0 }
  0x63   : > { %s1697_s11 = sand.u32 (!%p1836_p7), 1, %s1442_s19   ;;  %p1837_p3 = scmp.ne.s32.totalorder (!%p1836_p7), %s1829_s28, 0 }
  0x64   : > { %252 = sbr.rel (%p1836_p7) target bundleno = 681 (0x2a9), region = 40  ;;  %s1107_s14 = sshll.u32 (!%p1836_p7), %s1697_s11, 2 }
  0x65   : > { %s255_s16 = scalar_lea.sflag (!%p1836_p7), [#allocation6], %s1697_s11  ;;  %s258_s7 = scalar_lea.vmem (!%p1836_p7), [#allocation5], %s1107_s14 }
  0x6b   : > { %1425 = dma.done.wait (%p1837_p3), %s255_s16, 64  }
  0x6c   : > { %1427 = vsyncadd (%p1837_p3), %s255_s16, 4294967232  ;;  %p1838_p1 = scmp.ne.s32.totalorder %s1827_s26, 0 }
  0x6e   : > { %1429 = dma.done.wait (%p1838_p1), [#allocation9], 576  }
  0x6f   : > { %1431 = vsyncadd (%p1838_p1), [#allocation9], 4294966720  ;;  %v356_v0 = vlaneseq  ;;  %v1465_v1 = vmov 1983009808   ;;  %vm342_vm0 = vcmask 134144   ;;  %vm344_vm1 = vcmask 273544  }
  0x70   : > { %v354_v2 = vunpack.c.l.s4 %v1465_v1  ;;  %v1466_v4 = vmov 0   ;;  %vm346_vm2 = vcmask 1043594   ;;  %vm347_vm3 = vcmask 1047558   ;;  %v1716_v9 = vld [vmem:[%s258_s7] sm:$0xf]  ;;  %s1467_s24 = smov 17  }
  0x71   : > { %v357_v3 = vshrl.u32 %v356_v0, 7  ;;  %343 = vst.msk [vmem:[#allocation2] sm:$0xf] %vm342_vm0, %v1466_v4  ;;  %vm350_vm4 = vcmask 134146   ;;  %851 = vmatprep.mubr.bf16.mxu0 %v1466_v4  ;;  %871 = vmatprep.mubr.bf16.mxu1 %v1466_v4  ;;  %vm348_vm5 = vmor %vm347_vm3, %vm346_vm2  ;;  %s1468_s25 = smov 16   ;;  %s1469_s6 = smov 2   ;;  %v311_v62 = vunpack.c.l.bf16 %v1716_v9 }
  0x72   : > { %345 = vst.msk [vmem:[#allocation2 + $0x8] sm:$0xf] %vm344_vm1, %v1466_v4  ;;  %v355_v5 = vunpack.c.0.s8 %v354_v2  ;;  %1269 = vset.pattern.permute.xlu1 %v1466_v4  ;;  %v1116_v10 = vld.sshfl [vmem:[%s1821_s4] sm:$0x11 pattern:$0x76325410] }
  0x73   : > { %351 = vst.msk [vmem:[#allocation2 + $0x8] sm:$0xc] %vm350_vm4, %v1466_v4  ;;  %v389_v7 = vsub.s32 0, %v357_v3  ;;  %v439_v8 = vsub.s32 1, %v357_v3  ;;  %v486_v12 = vcombine.high %v1116_v10, %v1116_v10  ;;  %v488_v13 = vpack.i.b16 %v1116_v10, %v1116_v10  ;;  %s1470_s13 = smov 18   ;;  %s1471_s27 = smov 32  }
  0x74   : > { %349 = vst.msk [vmem:[#allocation2] sm:$0xcc] %vm348_vm5, %v1466_v4  ;;  %v358_v6 = vsub.s32 %v355_v5, %v357_v3  ;;  %v1114_v14 = vld.sshfl [vmem:[%s1821_s4] sm:$0x22 pattern:$0x76325410]  ;;  %v313_v63 = vcombine.high %v311_v62, %v311_v62 }
  0x75   : > { %v433_v15 = vcombine.high %v1114_v14, %v1114_v14  ;;  %v435_v16 = vpack.i.b16 %v1114_v14, %v1114_v14  ;;  %v493_v17 = vrot.slane %v488_v13, %v389_v7  ;;  %v495_v18 = vpack.i.b16 %v486_v12, %v486_v12  ;;  %s1472_s10 = smov 34   ;;  %s1473_s9 = smov 127  }
  0x76   : > { %v359_v11 = vrot.slane %v1716_v9, %v358_v6  ;;  %vm367_vm6 = vcmask 1041544   ;;  %vm368_vm7 = vcmask 1045508   ;;  %vm363_vm8 = vcmask 138240   ;;  %s1474_s14 = smov 111   ;;  %s1475_s16 = smov 95  }
  0x77   : > { %v440_v19 = vrot.slane %v435_v16, %v439_v8  ;;  %v442_v20 = vpack.i.b16 %v433_v15, %v433_v15  ;;  %v500_v21 = vrot.slane %v495_v18, %v389_v7  ;;  %vm371_vm9 = vcmask 132096   ;;  %vm369_vm10 = vmor %vm368_vm7, %vm367_vm6  ;;  %s1476_s7 = smov 126   ;;  %s1477_s26 = smov 112  }
  0x78   : > { %360 = vrot.lane.b32.xlu0 %v359_v11, %s1467_s24  ;;  %vm456_vm11 = vcmask 15360   ;;  %vm509_vm12 = vcmask 130048   ;;  %vm577_vm13 = vcmask 146432   ;;  %vm630_vm14 = vcmask 261120   ;;  %s1478_s28 = smov 110   ;;  %s1479_s30 = smov 96  }
  0x79   : > { %v447_v22 = vrot.slane %v442_v20, %v439_v8  ;;  %v1725_v23 = vcombine.low %v493_v17, %v500_v21  ;;  %vm698_vm15 = vcmask 277504   ;;  %s1480_s17 = smov 94   ;;  %vm315_vm0 = vcmask 1043456  }
  0x7a   : > { %v316_v0 = vsel %vm315_vm0, %v311_v62, 0.0  ;;  %v317_v1 = vsel %vm315_vm0, %v313_v63, 0.0  ;;  %vm418_vm1 = vcmask 1039360   ;;  %vm471_vm2 = vcmask 1031168  }
  0x7b   : > { %v1115_v24 = vcombine.low %v440_v19, %v447_v22  ;;  %506 = vrot.lane.b32.xlu1 %v1725_v23, %s1468_s25  ;;  %v318_v2 = vadd.f32 %v317_v1, %v316_v0  ;;  %vm524_vm3 = vcmask 916480   ;;  %vm539_vm4 = vcmask 908288   ;;  %v1278_v0 = vld [vmem:[#allocation10] sm:$0xff]   ;;  %v1280_v1 = vld [vmem:[#allocation10 + $0x10] sm:$0xff]  }
  0x7c   : > { %vm592_vm5 = vcmask 900096   ;;  %vm660_vm6 = vcmask 777216   ;;  %vm645_vm7 = vcmask 785408  }
  0x7d   : > { %453 = vrot.lane.b32.xlu0 %v1115_v24, %s1469_s6  ;;  %s1110_s6 = sshll.u32 %s1697_s11, 4 }
  0x7f   : > { %574 = vrot.lane.b32.xlu1 %v1115_v24, %s1470_s13  ;;  %s1150_s13 = sshll.u32 %s1450_s21, 8 }
  0x81   : > { %627 = vrot.lane.b32.xlu0 %v1725_v23, %s1471_s27  ;;  %s297_s27 = scalar_lea.vmem [#allocation11], %s1110_s6 }
  0x83   : > { %695 = vrot.lane.b32.xlu1 %v1115_v24, %s1472_s10  ;;  %s981_s10 = sshll.u32 %s297_s27, 4  ;;  %s1770_s10 = int_to_ptr.vmem [resolvable:$true] %s981_s10 }
  0x84   : > { %s1372_s21 = scalar_lea.vmem %s1770_s10, 256 }
  0x85   : > { %p1373_p11 = scmp.ne.s32.totalorder %s1770_s10, %s1372_s21 }
  0x87   : > { %p1374_p4 = pnand %p1373_p11, %p1645_p8 }
  0x89   : > { %p1375_p2 = pneg %p1374_p4 }
  0xea   : > { %v361_v25 = vpop.permute.xlu0 %360 }
  0xeb   : > { %v362_v26 = vrot.slane %v361_v25, 4 }
  0xed   : > { %v364_v27 = vsel %vm363_vm8, %v362_v26, %v361_v25  ;;  %372 = vst.msk [vmem:[#allocation2 + $0x8] sm:$0x3] %vm371_vm9, %v362_v26  ;;  %v507_v30 = vpop.permute.xlu1 %506  ;;  %vm713_vm8 = vcmask 769024   ;;  %vm799_vm9 = vcmask 588800  }
  0xee   : > { %370 = vst.msk [vmem:[#allocation2] sm:$0x33] %vm369_vm10, %v364_v27  ;;  %v508_v34 = vrot.slane %v507_v30, 4  ;;  %vm324_vm10 = vcmask 60416  }
  0xef   : > { %v454_v31 = vpop.permute.xlu0 %453 }
  0xf0   : > { %v455_v32 = vrot.slane %v454_v31, 4  ;;  %v510_v42 = vsel %vm509_vm12, %v508_v34, %v507_v30 }
  0xf1   : > { %v575_v38 = vpop.permute.xlu1 %574 }
  0xf2   : > { %v457_v36 = vsel %vm456_vm11, %v455_v32, %v454_v31  ;;  %v576_v43 = vrot.slane %v575_v38, 4  ;;  %vm340_vm11 = vcmask 57344  }
  0xf3   : > { %v628_v44 = vpop.permute.xlu0 %627 }
  0xf4   : > { %v407_v29 = vld [vmem:[#allocation2 + $0x8] sm:$0xf]  ;;  %v578_v47 = vsel %vm577_vm13, %v576_v43, %v575_v38  ;;  %v629_v48 = vrot.slane %v628_v44, 4 }
  0xf5   : > { %v1729_v28 = vld [vmem:[#allocation2] sm:$0xff]  ;;  %412 = vrot.lane.b32.xlu1 %v407_v29, %s1473_s9  ;;  %v529_v33 = vld [vmem:[#allocation2 + $0x8] sm:$0xf]  ;;  %v696_v49 = vpop.permute.xlu1 %695 }
  0xf6   : > { %410 = vrot.lane.b32.xlu0 %v1729_v28, %s1473_s9  ;;  %v423_v35 = vld [vmem:[#allocation2 + $0x8] sm:$0xf]  ;;  %v460_v39 = vmul.bf16 %v1729_v28, %v457_v36  ;;  %v513_v45 = vmul.bf16 %v510_v42, %v1729_v28  ;;  %v581_v51 = vmul.bf16 %v578_v47, %v1729_v28  ;;  %v631_v53 = vsel %vm630_vm14, %v629_v48, %v628_v44 }
  0xf7   : > { %v650_v37 = vld [vmem:[#allocation2 + $0x8] sm:$0xf]  ;;  %v461_v40 = vmul.bf16 %v455_v32, %v423_v35  ;;  %v697_v54 = vrot.slane %v696_v49, 4  ;;  %v634_v56 = vmul.bf16 %v631_v53, %v1729_v28  ;;  %v404_v10 = vmul.bf16 %v1725_v23, %v1729_v28 }
  0xf8   : > { %v476_v41 = vld [vmem:[#allocation2 + $0x8] sm:$0xf] }
  0xf9   : > { %534 = vrot.lane.b32.xlu1 %v529_v33, %s1474_s14  ;;  %v514_v46 = vmul.bf16 %v508_v34, %v476_v41  ;;  %v544_v50 = vld [vmem:[#allocation2 + $0x8] sm:$0xf]  ;;  %v699_v58 = vsel %vm698_vm15, %v697_v54, %v696_v49 }
  0xfa   : > { %532 = vrot.lane.b32.xlu0 %v1729_v28, %s1474_s14  ;;  %v582_v52 = vmul.bf16 %v576_v43, %v544_v50  ;;  %v597_v55 = vld [vmem:[#allocation2 + $0x8] sm:$0xf]  ;;  %v702_v60 = vmul.bf16 %v699_v58, %v1729_v28 }
  0xfb   : > { %v635_v57 = vmul.bf16 %v629_v48, %v597_v55  ;;  %v665_v59 = vld [vmem:[#allocation2 + $0x8] sm:$0xf] }
  0xfc   : > { %v703_v61 = vmul.bf16 %v697_v54, %v665_v59 }
  0xfd   : > { %655 = vrot.lane.b32.xlu1 %v650_v37, %s1475_s16 }
  0xfe   : > { %653 = vrot.lane.b32.xlu0 %v1729_v28, %s1475_s16  ;;  %s1768_s16 = scalar_lea.hbm %s1822_s5, %s1150_s13 }
 0x101   : > { %466 = vrot.lane.b32.xlu1 %v461_v40, %s1476_s7 }
 0x102   : > { %464 = vrot.lane.b32.xlu0 %v460_v39, %s1476_s7  ;;  %s965_s7 = scalar_lea.sflag [#allocation7], %s1697_s11 }
 0x105   : > { %519 = vrot.lane.b32.xlu1 %v514_v46, %s1477_s26 }
 0x106   : > { %517 = vrot.lane.b32.xlu0 %v513_v45, %s1477_s26  ;;  %s1488_s26 = smov [#allocation11]  }
 0x109   : > { %587 = vrot.lane.b32.xlu1 %v582_v52, %s1478_s28 }
 0x10a   : > { %585 = vrot.lane.b32.xlu0 %v581_v51, %s1478_s28  ;;  %s1376_s28 = sshll.u32 %s1488_s26, 4  ;;  %s1377_s28 = int_to_ptr.vmem [resolvable:$false] %s1376_s28 }
 0x10b   : > { %p1379_p6 = scmp.lt.s32.totalorder %s1770_s10, %s1377_s28 }
 0x10d   : > { %640 = vrot.lane.b32.xlu1 %v635_v57, %s1479_s30 }
 0x10e   : > { %638 = vrot.lane.b32.xlu0 %v634_v56, %s1479_s30  ;;  %s1378_s30 = scalar_lea.vmem %s1377_s28, 512 }
 0x10f   : > { %p1380_p12 = scmp.lt.s32.totalorder %s1378_s30, %s1372_s21 }
 0x111   : > { %708 = vrot.lane.b32.xlu1 %v703_v61, %s1480_s17  ;;  %p1381_p0 = por %p1380_p12, %p1379_p6 }
 0x112   : > { %706 = vrot.lane.b32.xlu0 %v702_v60, %s1480_s17 }
 0x113   : > { %p1382_p5 = pnand %p1381_p0, %p1375_p2 }
 0x131   : > { %319 = vadd.xlane.f32.xlu0 %v318_v2  ;;  %v1279_v2 = vld [vmem:[#allocation10 + $0x8] sm:$0xff]  }
 0x167   : > { %v413_v3 = vpop.permute.xlu1 %412 }
 0x168   : > { %v411_v5 = vpop.permute.xlu0 %410  ;;  %v415_v6 = vrot.slane %v413_v3, 4  ;;  %v1281_v3 = vld [vmem:[#allocation10 + $0x18] sm:$0xff]  }
 0x169   : > { %v414_v7 = vrot.slane %v411_v5, 4 }
 0x16b   : > { %v417_v8 = vsel %vm315_vm0, %v414_v7, %v415_v6  ;;  %v535_v9 = vpop.permute.xlu1 %534  ;;  %v322_v6 = vld [vmem:[#allocation8] sm:$0xf] }
 0x16c   : > { %v419_v11 = vsel %vm418_vm1, %v411_v5, %v417_v8  ;;  %v533_v12 = vpop.permute.xlu0 %532  ;;  %v537_v21 = vrot.slane %v535_v9, 4  ;;  %v1481_v5 = vmov 7  }
 0x16d   : > { %v1129_v13 = vcombine.high %v404_v10, %v419_v11  ;;  %v1128_v14 = vcombine.low %v404_v10, %v419_v11  ;;  %v536_v22 = vrot.slane %v533_v12, 4  ;;  %1277 = vset.pattern.permute.xlu0 %v1481_v5 }
 0x16f   : > { %819 = vmatprep.subr.bf16.mxu0 %v1129_v13  ;;  %1151 = vmatprep.subr.bf16.mxu1 %v1129_v13  ;;  %v656_v15 = vpop.permute.xlu1 %655  ;;  %v538_v28 = vsel %vm315_vm0, %v536_v22, %v537_v21 }
 0x170   : > { %820 = vmatpush1.bf16.msra.mxu0 %v1128_v14  ;;  %1156 = vmatpush1.bf16.msra.mxu1 %v1128_v14  ;;  %v654_v16 = vpop.permute.xlu0 %653  ;;  %v658_v30 = vrot.slane %v656_v15, 4  ;;  %v540_v41 = vsel %vm539_vm4, %v533_v12, %v538_v28  ;;  %v1487_v28 = vmov 6  }
 0x171   : > { %v657_v31 = vrot.slane %v654_v16, 4 }
 0x173   : > { %v467_v17 = vpop.permute.xlu1 %466  ;;  %v659_v42 = vsel %vm315_vm0, %v657_v31, %v658_v30 }
 0x174   : > { %v465_v18 = vpop.permute.xlu0 %464  ;;  %v469_v19 = vrot.slane %v467_v17, 4  ;;  %v661_v51 = vsel %vm660_vm6, %v654_v16, %v659_v42 }
 0x175   : > { %v468_v20 = vrot.slane %v465_v18, 4 }
 0x177   : > { %v520_v24 = vpop.permute.xlu1 %519  ;;  %v470_v25 = vsel %vm315_vm0, %v468_v20, %v469_v19 }
 0x178   : > { %v518_v23 = vpop.permute.xlu0 %517  ;;  %v522_v26 = vrot.slane %v520_v24, 4  ;;  %v472_v32 = vsel %vm471_vm2, %v465_v18, %v470_v25  ;;  %v1482_v24 = vmov 1   ;;  %v1484_v25 = vmov 3  }
 0x179   : > { %v521_v27 = vrot.slane %v518_v23, 4 }
 0x17b   : > { %v523_v29 = vsel %vm315_vm0, %v521_v27, %v522_v26  ;;  %v588_v34 = vpop.permute.xlu1 %587  ;;  %v1485_v26 = vmov 4   ;;  %v1486_v27 = vmov 5  }
 0x17c   : > { %v525_v33 = vsel %vm524_vm3, %v518_v23, %v523_v29  ;;  %v586_v35 = vpop.permute.xlu0 %585  ;;  %v590_v38 = vrot.slane %v588_v34, 4  ;;  %v1483_v23 = vmov 2  }
 0x17d   : > { %v1130_v36 = vcombine.low %v472_v32, %v525_v33  ;;  %v1131_v37 = vcombine.high %v472_v32, %v525_v33  ;;  %v589_v39 = vrot.slane %v586_v35, 4 }
 0x17f   : > { %v591_v40 = vsel %vm315_vm0, %v589_v39, %v590_v38  ;;  %821 = vmatprep.subr.bf16.mxu0 %v1131_v37  ;;  %1152 = vmatprep.subr.bf16.mxu1 %v1131_v37  ;;  %v641_v44 = vpop.permute.xlu1 %640 }
 0x180   : > { %v593_v43 = vsel %vm592_vm5, %v586_v35, %v591_v40  ;;  %822 = vmatpush1.bf16.msra.mxu0 %v1130_v36  ;;  %1157 = vmatpush1.bf16.msra.mxu1 %v1130_v36  ;;  %v639_v45 = vpop.permute.xlu0 %638  ;;  %v643_v48 = vrot.slane %v641_v44, 4 }
 0x181   : > { %v1132_v46 = vcombine.low %v540_v41, %v593_v43  ;;  %v1133_v47 = vcombine.high %v540_v41, %v593_v43  ;;  %v642_v49 = vrot.slane %v639_v45, 4 }
 0x183   : > { %v644_v50 = vsel %vm315_vm0, %v642_v49, %v643_v48  ;;  %823 = vmatprep.subr.bf16.mxu0 %v1133_v47  ;;  %1153 = vmatprep.subr.bf16.mxu1 %v1133_v47  ;;  %v709_v53 = vpop.permute.xlu1 %708 }
 0x184   : > { %v646_v52 = vsel %vm645_vm7, %v639_v45, %v644_v50  ;;  %824 = vmatpush1.bf16.msra.mxu0 %v1132_v46  ;;  %1158 = vmatpush1.bf16.msra.mxu1 %v1132_v46  ;;  %v707_v54 = vpop.permute.xlu0 %706  ;;  %v711_v57 = vrot.slane %v709_v53, 4 }
 0x185   : > { %v1134_v55 = vcombine.low %v646_v52, %v661_v51  ;;  %v1135_v56 = vcombine.high %v646_v52, %v661_v51  ;;  %v710_v58 = vrot.slane %v707_v54, 4 }
 0x187   : > { %v712_v59 = vsel %vm315_vm0, %v710_v58, %v711_v57  ;;  %825 = vmatprep.subr.bf16.mxu0 %v1135_v56  ;;  %1154 = vmatprep.subr.bf16.mxu1 %v1135_v56 }
 0x188   : > { %v714_v60 = vsel %vm713_vm8, %v707_v54, %v712_v59  ;;  %826 = vmatpush1.bf16.msra.mxu0 %v1134_v55  ;;  %1159 = vmatpush1.bf16.msra.mxu1 %v1134_v55 }
 0x189   : > { %v1136_v61 = vcombine.low %v714_v60, %v714_v60  ;;  %v1137_v62 = vcombine.high %v714_v60, %v714_v60 }
 0x18b   : > { %1138 = vmatprep.subr.msk.bf16.mxu0 %vm315_vm0, %v1137_v62  ;;  %1155 = vmatprep.subr.msk.bf16.mxu1 %vm315_vm0, %v1137_v62  ;;  %v814_v63 = vsel %vm315_vm0, %v1136_v61, 0 }
 0x18c   : > { %828 = vmatpush1.bf16.msra.mxu0 %v814_v63  ;;  %1160 = vmatpush1.bf16.msra.mxu1 %v814_v63 }
 0x18f   : > { %1139 = vmatmul.mubr.msk.bf16.vlgmr.msra.gmra.mrb[0].mxu0 %vm799_vm9, %v1278_v0  ;;  %1141 = vmatmul.mubr.msk.bf16.vlgmr.msra.gmra.mrb[0].mxu1 %vm799_vm9, %v1280_v1 }
 0x190   : > { %861 = vmatprep.mubr.bf16.mxu0 %v1466_v4  ;;  %881 = vmatprep.mubr.bf16.mxu1 %v1466_v4  ;;  %v332_v4 = vld [vmem:[%s1819_s2] sm:$0x1] }
 0x197   : > { %1140 = vmatmul.mubr.msk.bf16.gmra.mrb[4].mxu0 %vm799_vm9, %v1279_v2  ;;  %1142 = vmatmul.mubr.msk.bf16.gmra.mrb[4].mxu1 %vm799_vm9, %v1281_v3 }
 0x1be   : > { %v320_v7 = vpop.xlane.xlu0 %319 }
 0x1bf   : > { %v321_v8 = vmul.f32 0.00390625, %v320_v7 }
 0x1c1   : > { %v323_v10 = vmul.f32 %v322_v6, %v321_v8 }
 0x1c3   : > { %v325_v11 = vsel %vm324_vm10, %v323_v10, 0.0 }
 0x1c4   : > { %v326_v9 = vrot.slane %v325_v11, 4 }
 0x1c6   : > { %v327_v12 = vadd.f32 %v326_v9, %v325_v11 }
 0x1c8   : > { %v328_v13 = vrot.slane %v327_v12, 2 }
 0x1ca   : > { %v329_v14 = vadd.f32 %v328_v13, %v327_v12 }
 0x1cc   : > { %v330_v15 = vrot.slane %v329_v14, 1 }
 0x1ce   : > { %v331_v16 = vadd.f32 %v330_v15, %v329_v14 }
 0x1d0   : > { %v333_v17 = vadd.f32 %v332_v4, %v331_v16 }
 0x1d2   : > { %v1111_v18 = vmul.f32 -1.442695, %v333_v17 }
 0x1d4   : > { %1282 = vpow2.f32 %v1111_v18 }
 0x1de   : > { %v1283_v19 = vpop.eup %1282 }
 0x1df   : > { %v337_v20 = vadd.f32 1.0, %v1283_v19 }
 0x1e1   : > { %1284 = vrcp.f32 %v337_v20 }
 0x1eb   : > { %v1285_v21 = vpop.eup %1284 }
 0x1ec   : > { %341 = vst.msk [vmem:[#allocation4] sm:$0x1] %vm340_vm11, %v1285_v21 }
 0x1f3   : > { %v1143_v22 = vld [vmem:[#allocation4] ss:$0 sm:$0xff] }
 0x1f4   : > { %899 = vperm.xlu1 %1269, %v1143_v22  }
 0x1f8   : > { %1270 = vset.pattern.permute.xlu1 %v1482_v24 }
 0x1f9   : > { %907 = vperm.xlu1 %1270, %v1143_v22  }
 0x1fd   : > { %1271 = vset.pattern.permute.xlu1 %v1483_v23 }
 0x1fe   : > { %915 = vperm.xlu1 %1271, %v1143_v22  }
 0x202   : > { %1272 = vset.pattern.permute.xlu1 %v1484_v25 }
 0x203   : > { %923 = vperm.xlu1 %1272, %v1143_v22  }
 0x207   : > { %1273 = vset.pattern.permute.xlu1 %v1485_v26 }
 0x208   : > { %931 = vperm.xlu1 %1273, %v1143_v22  }
 0x20c   : > { %1274 = vset.pattern.permute.xlu1 %v1486_v27 }
 0x20d   : > { %939 = vperm.xlu1 %1274, %v1143_v22  }
 0x211   : > { %1275 = vset.pattern.permute.xlu1 %v1487_v28 }
 0x212   : > { %947 = vperm.xlu1 %1275, %v1143_v22  }
 0x216   : > { %1276 = vset.pattern.permute.xlu1 %v1481_v5 }
 0x217   : > { %955 = vperm.xlu1 %1276, %v1143_v22  }
 0x262   : > { %v853_v29 = vpop.f32.mrb[0].mxu0  ;;  %v873_v30 = vpop.f32.mrb[0].mxu1 }
 0x263   : > { %v855_v31 = vpop.f32.mrb[1].mxu0  ;;  %v875_v32 = vpop.f32.mrb[1].mxu1 }
 0x264   : > { %v857_v33 = vpop.f32.mrb[2].mxu0  ;;  %v877_v34 = vpop.f32.mrb[2].mxu1 }
 0x265   : > { %v859_v35 = vpop.f32.mrb[3].mxu0  ;;  %v879_v36 = vpop.f32.mrb[3].mxu1 }
 0x26a   : > { %v863_v37 = vpop.f32.mrb[4].mxu0  ;;  %v883_v38 = vpop.f32.mrb[4].mxu1 }
 0x26b   : > { %v865_v39 = vpop.f32.mrb[5].mxu0  ;;  %v885_v40 = vpop.f32.mrb[5].mxu1 }
 0x26c   : > { %v867_v41 = vpop.f32.mrb[6].mxu0  ;;  %v887_v42 = vpop.f32.mrb[6].mxu1 }
 0x26d   : > { %v869_v43 = vpop.f32.mrb[7].mxu0  ;;  %v889_v44 = vpop.f32.mrb[7].mxu1 }
 0x273   : > { %v900_v45 = vpop.permute.xlu1 %899 }
 0x274   : > { %v902_v47 = vmul.f32 %v900_v45, %v853_v29  ;;  %v903_v48 = vmul.f32 %v900_v45, %v855_v31 }
 0x278   : > { %v908_v46 = vpop.permute.xlu1 %907 }
 0x279   : > { %v910_v49 = vmul.f32 %v908_v46, %v857_v33  ;;  %v911_v50 = vmul.f32 %v908_v46, %v859_v35 }
 0x27b   : > { %v912_v51 = vadd.f32 %v910_v49, %v902_v47  ;;  %v913_v52 = vadd.f32 %v911_v50, %v903_v48 }
 0x27d   : > { %v916_v53 = vpop.permute.xlu1 %915 }
 0x27e   : > { %v918_v54 = vmul.f32 %v916_v53, %v863_v37  ;;  %v919_v55 = vmul.f32 %v916_v53, %v865_v39 }
 0x280   : > { %v920_v56 = vadd.f32 %v918_v54, %v912_v51  ;;  %v921_v57 = vadd.f32 %v919_v55, %v913_v52 }
 0x282   : > { %v924_v58 = vpop.permute.xlu1 %923 }
 0x283   : > { %v926_v59 = vmul.f32 %v924_v58, %v867_v41  ;;  %v927_v60 = vmul.f32 %v924_v58, %v869_v43 }
 0x285   : > { %v928_v61 = vadd.f32 %v926_v59, %v920_v56  ;;  %v929_v62 = vadd.f32 %v927_v60, %v921_v57 }
 0x287   : > { %v932_v63 = vpop.permute.xlu1 %931 }
 0x288   : > { %v934_v0 = vmul.f32 %v932_v63, %v873_v30  ;;  %v935_v1 = vmul.f32 %v932_v63, %v875_v32 }
 0x28a   : > { %v936_v2 = vadd.f32 %v934_v0, %v928_v61  ;;  %v937_v3 = vadd.f32 %v935_v1, %v929_v62 }
 0x28c   : > { %v940_v5 = vpop.permute.xlu1 %939 }
 0x28d   : > { %v942_v6 = vmul.f32 %v940_v5, %v877_v34  ;;  %v943_v7 = vmul.f32 %v940_v5, %v879_v36 }
 0x28f   : > { %v944_v8 = vadd.f32 %v942_v6, %v936_v2  ;;  %v945_v10 = vadd.f32 %v943_v7, %v937_v3 }
 0x291   : > { %v948_v11 = vpop.permute.xlu1 %947 }
 0x292   : > { %v950_v9 = vmul.f32 %v948_v11, %v883_v38  ;;  %v951_v12 = vmul.f32 %v948_v11, %v885_v40 }
 0x294   : > { %v952_v13 = vadd.f32 %v950_v9, %v944_v8  ;;  %v953_v14 = vadd.f32 %v951_v12, %v945_v10 }
 0x296   : > { %v956_v15 = vpop.permute.xlu1 %955 }
 0x297   : > { %v958_v4 = vmul.f32 %v956_v15, %v887_v42  ;;  %v959_v16 = vmul.f32 %v956_v15, %v889_v44 }
 0x299   : > { %v960_v17 = vadd.f32 %v958_v4, %v952_v13  ;;  %v961_v18 = vadd.f32 %v959_v16, %v953_v14 }
 0x29b   : > { %962 = vst [vmem:[%s297_s27] sm:$0xff] %v960_v17  ;;  %963 = vst [vmem:[%s297_s27 + $0x8] sm:$0xff] %v961_v18 }
 0x29c   : > { %1385 = shalt.err (!%p1382_p5)
}
 0x29d   : > { %s1386_s11 = scalar_lea.hbm %s1768_s16, 256  ;;  %s1390_s25 = scalar_lea.hbm %s1822_s5, 512 }
 0x29e   : > { %p1387_p10 = scmp.ne.s32.totalorder %s1768_s16, %s1386_s11  ;;  %p1391_p7 = scmp.lt.u32.totalorder %s1768_s16, %s1822_s5 }
 0x29f   : > { %p1392_p3 = scmp.lt.u32.totalorder %s1390_s25, %s1386_s11  ;;  %p1394_p11 = scmp.lt.u32.totalorder %s1386_s11, %s1768_s16 }
 0x2a0   : > { %p1388_p13 = pnand %p1387_p10, %p1645_p8 }
 0x2a1   : > { %p1393_p1 = por %p1392_p3, %p1391_p7 }
 0x2a2   : > { %p1389_p9 = pneg %p1388_p13 }
 0x2a3   : > { %p1395_p4 = por %p1394_p11, %p1393_p1 }
 0x2a5   : > { %p1396_p2 = pnand %p1395_p4, %p1389_p9 }
 0x2a7   : > { %1399 = shalt.err (!%p1396_p2)
}
 0x2a8   : > { %1171 = dma.vmem_to_hbm [thread:$0]  (%p1645_p8), %s1770_s10, 256, %s1768_s16, %s965_s7  }
 0x2a9 PF: > { %s993_s27 = sand.u32 1, %s1438_s18   ;;  %p1839_p6 = scmp.ne.s32.totalorder %s1830_s29, 0 }
 0x2aa   : > { %p1840_p12 = scmp.ge.s32.totalorder %s1458_s23, 2  ;;  %s994_s9 = scalar_lea.sflag [#allocation7], %s993_s27 }
 0x2ac   : > { %p1185_p0 = pnand %p1840_p12, %p1839_p6 }
 0x2ae   : > { %1433 = dma.done.wait (!%p1185_p0), %s994_s9, 256  }
 0x2af   : > { %1435 = vsyncadd (!%p1185_p0), %s994_s9, 4294967040  ;;  %s22_s23 = sadd.s32 1, %s1458_s23   ;;  %s1841_s18 = smov %s1442_s19 }
 0x2b0   : > { %p19_p5 = scmp.ge.s32.totalorder %s22_s23, 4   ;;  %s1842_s19 = smov %s1446_s20 }
 0x2b1   : > { %s1843_s20 = smov %s1654_s15  ;;  %s1844_s21 = smov %s1454_s22 }
 0x2b2   : > { %s1845_s22 = smov %s1847_s8  ;;  %21 = sbr.rel (!%p19_p5) target bundleno = 7 (0x7), region = 100 }
 0x2b9   :  { %999 = vsyncpa [#allocation6], 1 }
 0x2ba   :  { %1001 = vsyncpa [#allocation6 + $0x1], 1 }
 0x2bb   :  { %1002 = vsyncpa [#allocation9], 1 }
 0x2bc   :  { %1003 = vsyncpa [#allocation7], 1 }
 0x2bd   :  { %1005 = vsyncpa [#allocation7 + $0x1], 1 }

</bundles_post_ra>
